<compile_context>
chip_gen: v5e
topology: v5e:2x2
jax: 0.10.0
libtpu: 0.0.40
codegen_flags: <defaults>
</compile_context>

<pallas_src>
import functools

import jax
import jax.numpy as jnp
from jax.experimental import pallas as pl
from jax.experimental.pallas import tpu as pltpu


def _round_up(a, b):
    return ((a + b - 1) // b) * b


def _vmem_budget_bytes():
    """(working-set budget, vmem_limit_bytes) per TPU generation."""
    cap = None
    try:
        info = pltpu.get_tpu_info()
        cap = getattr(info, "vmem_capacity_bytes", None)
    except Exception:
        cap = None
    if cap is not None and cap >= 100 * 1024 * 1024:
        # v5e / v6e: 128 MiB physical VMEM.
        return 80 * 1024 * 1024, 100 * 1024 * 1024
    # v7x (64 MiB physical) or unknown: stay conservative, leave pipeline headroom.
    return 40 * 1024 * 1024, 48 * 1024 * 1024


def _proj_kernel(x_ref, w_ref, o_ref, *, compute_dtype):
    # One (tm, K) x (K, Npad) MXU matmul per grid step.  The activation tile is
    # cast to the compute dtype on the VPU *after* the pipelined DMA, so x only
    # crosses HBM once at its original dtype.  f32 accumulation on the MXU.
    x = x_ref[...].astype(compute_dtype)
    o_ref[...] = jnp.dot(
        x, w_ref[...], preferred_element_type=jnp.float32
    ).astype(o_ref.dtype)


def _proj_pallas(x2d, proj, out_dtype, *, compute_dtype=jnp.bfloat16, tm_max=2048):
    M, K = x2d.shape
    N = proj.shape[-1]

    # Lane-dense minor dims.
    Npad = _round_up(N, 128)
    Kpad = _round_up(K, 128)

    x_item = jnp.dtype(x2d.dtype).itemsize
    w_item = jnp.dtype(compute_dtype).itemsize
    o_item = jnp.dtype(out_dtype).itemsize

    def working_set(tm):
        # Double-buffered x tile (original dtype) + double-buffered resident
        # weight (compute dtype) + double-buffered output tile (out_dtype).
        return (2 * tm * Kpad * x_item
                + 2 * Kpad * Npad * w_item
                + 2 * tm * Npad * o_item)

    vmem_budget, vmem_limit = _vmem_budget_bytes()

    if working_set(128) > vmem_budget:
        # Weight too large to keep resident under the per-generation budget;
        # would need K/N tiling which this projection layer never hits.
        return jnp.matmul(x2d, proj).astype(out_dtype)

    # Weight is small: cast (and pad) once in the wrapper so it sits in VMEM at
    # the compute dtype (half the resident footprint for bf16).
    wb = proj.astype(compute_dtype)
    if Npad != N or Kpad != K:
        wb = jnp.pad(wb, ((0, Kpad - K), (0, Npad - N)))
    if Kpad != K:
        # Exact: zero columns contribute nothing to the contraction.  Only
        # triggers for non-128-multiple CLIP widths (rare).
        x2d = jnp.pad(x2d, ((0, 0), (0, Kpad - K)))

    # M tile: biggest MXU-aligned (multiple of 128) tile that fits the budget.
    tm = _round_up(max(128, min(int(tm_max), 8192)), 128)
    while tm > 128 and working_set(tm) > vmem_budget:
        tm = max(128, _round_up(tm // 2, 128))
    tm = min(tm, _round_up(M, 128))
    if M > 256:
        # Guarantee >= 2 (balanced) grid steps so "parallel" can split the M
        # axis across v7x's two TensorCores.
        tm = min(tm, _round_up(pl.cdiv(M, 2), 256))

    grid_m = pl.cdiv(M, tm)  # ragged last block handled (masked) by Pallas

    kernel = functools.partial(_proj_kernel, compute_dtype=compute_dtype)

    out = pl.pallas_call(
        kernel,
        out_shape=jax.ShapeDtypeStruct((M, Npad), out_dtype),
        grid=(grid_m,),
        in_specs=[
            pl.BlockSpec((tm, Kpad), lambda i: (i, 0)),    # activations: stream M tiles
            pl.BlockSpec((Kpad, Npad), lambda i: (0, 0)),  # weight: resident in VMEM
        ],
        out_specs=pl.BlockSpec((tm, Npad), lambda i: (i, 0)),
        compiler_params=pltpu.CompilerParams(
            dimension_semantics=("parallel",),             # megacore-shard M
            vmem_limit_bytes=vmem_limit,
        ),
        cost_estimate=pl.CostEstimate(
            flops=2 * M * Kpad * Npad,
            transcendentals=0,
            bytes_accessed=(M * Kpad * x_item
                            + Kpad * Npad * w_item
                            + M * Npad * o_item),
        ),
    )(x2d, wb)

    if Npad != N:
        out = out[:, :N]
    return out


def proj_learner_forward(x, proj, *, use_pallas=None, out_dtype=None,
                         compute_dtype=jnp.bfloat16, tm_max=2048):
    """ProjLearner.forward: x @ proj (or passthrough if proj is None).

    x: [..., width], proj: [width, embed_dim] or None -> [..., embed_dim].
    compute_dtype: MXU operand dtype (bf16 default; pass jnp.float32 for full
    precision).  out_dtype: output dtype (defaults to x.dtype).
    """
    if proj is None:
        return x

    lead_shape = x.shape[:-1]
    K = x.shape[-1]
    N = proj.shape[-1]
    if out_dtype is None:
        out_dtype = x.dtype

    x2d = x.reshape(-1, K)
    M = x2d.shape[0]

    if use_pallas is None:
        # Tiny problems: pallas launch + DMA setup dominates; let XLA fuse it.
        use_pallas = (M >= 128 and K >= 128 and N >= 128)

    if use_pallas:
        out2d = _proj_pallas(x2d, proj, out_dtype,
                             compute_dtype=compute_dtype, tm_max=tm_max)
    else:
        out2d = jnp.matmul(x2d, proj).astype(out_dtype)

    return out2d.reshape(*lead_shape, N)


if __name__ == "__main__":
    key = jax.random.PRNGKey(0)
    k1, k2, k3, k4, k5, k6 = jax.random.split(key, 6)

    # 1) Pallas path, MXU-aligned CLIP-like shapes; tm_max=128 forces a
    #    multi-step M grid even at this small size.
    b, s, w, e = 2, 128, 256, 128
    x = jax.random.normal(k1, (b, s, w), dtype=jnp.float32)
    proj = jax.random.normal(k2, (w, e), dtype=jnp.float32) * (w ** -0.5)
    out = jax.block_until_ready(
        proj_learner_forward(x, proj, use_pallas=True, tm_max=128)
    )
    ref = x @ proj
    assert out.shape == (b, s, e) and out.dtype == x.dtype
    assert jnp.allclose(out, ref, atol=3e-2, rtol=3e-2)   # bf16 compute, f32 acc

    # 1b) bf16-output fast path (halved output writeback / vst pressure).
    out_bf16 = jax.block_until_ready(
        proj_learner_forward(x, proj, use_pallas=True, out_dtype=jnp.bfloat16)
    )
    assert out_bf16.dtype == jnp.bfloat16
    assert jnp.allclose(out_bf16.astype(jnp.float32), ref, atol=6e-2, rtol=6e-2)

    # 2) Unaligned dims: exercises K/N lane padding + ragged last M block
    #    (no explicit M padding anymore).
    b, s, w, e = 2, 65, 96, 80
    x = jax.random.normal(k3, (b, s, w), dtype=jnp.float32)
    proj = jax.random.normal(k4, (w, e), dtype=jnp.float32) * (w ** -0.5)
    out = jax.block_until_ready(proj_learner_forward(x, proj, use_pallas=True))
    ref = x @ proj
    assert out.shape == (b, s, e)
    assert jnp.allclose(out, ref, atol=3e-2, rtol=3e-2)

    # 3) Original tiny demo shapes: auto-dispatch takes the plain-XLA fallback
    #    (exact, matches the f32 reference bit-for-bit path).
    b, s, w, e = 2, 8, 32, 16
    x = jax.random.normal(k5, (b, s, w), dtype=jnp.float32)
    proj = jax.random.normal(k6, (w, e), dtype=jnp.float32) * (w ** -0.5)
    out = jax.block_until_ready(proj_learner_forward(x, proj))
    ref = x @ proj
    assert out.shape == (b, s, e)
    assert jnp.allclose(out, ref, atol=1e-5, rtol=1e-5)

    # proj=None passthrough (module semantics).
    assert proj_learner_forward(x, None) is x

    print("KERNEL_OK")
</pallas_src>

<mosaic_0001>
module attributes {stable_mosaic.version = 11 : i64} {
  func.func @_proj_kernel(%arg0: i32, %arg1: memref<128x256xf32, #tpu.memory_space<vmem>>, %arg2: memref<256x128xbf16, #tpu.memory_space<vmem>>, %arg3: memref<128x128xf32, #tpu.memory_space<vmem>>) attributes {dimension_semantics = [#tpu.dimension_semantics<parallel>], iteration_bounds = array<i64: 2>, scalar_prefetch = 0 : i64, scratch_operands = 0 : i64, tpu.core_type = #tpu.core_type<tc>, window_params = [{transform_indices = @transform_0, window_bounds = array<i64: 128, 256>}, {pipeline_mode = #tpu.pipeline_mode<synchronous>, transform_indices = @transform_1, window_bounds = array<i64: 256, 128>}, {transform_indices = @transform_2, window_bounds = array<i64: 128, 128>}]} {
    %c0 = arith.constant 0 : index
    %c0_0 = arith.constant 0 : index
    %0 = vector.load %arg1[%c0, %c0_0] : memref<128x256xf32, #tpu.memory_space<vmem>>, vector<128x256xf32>
    %1 = arith.truncf %0 : vector<128x256xf32> to vector<128x256xbf16>
    %c0_1 = arith.constant 0 : index
    %c0_2 = arith.constant 0 : index
    %2 = vector.load %arg2[%c0_1, %c0_2] : memref<256x128xbf16, #tpu.memory_space<vmem>>, vector<256x128xbf16>
    %cst = arith.constant dense<0.000000e+00> : vector<128x128xf32>
    %3 = tpu.matmul %1, %2, %cst {dimension_numbers = #tpu.dot_dimension_numbers<[1], [0], [0], [1], [0, 0, 1, 1], [], []>} : vector<128x256xbf16>, vector<256x128xbf16>, vector<128x128xf32> -> vector<128x128xf32>
    %c0_3 = arith.constant 0 : index
    %c0_4 = arith.constant 0 : index
    %4 = vector.load %arg3[%c0_3, %c0_4] : memref<128x128xf32, #tpu.memory_space<vmem>>, vector<128x128xf32>
    tpu.vector_store %arg3[%c0_3, %c0_4], %3 {strides = array<i32>} : memref<128x128xf32, #tpu.memory_space<vmem>>, vector<128x128xf32>,
    return
  }
  func.func @transform_0(%arg0: i32) -> (i32, i32) {
    %c0_i32 = arith.constant 0 : i32
    %c0_i32_0 = arith.constant 0 : i32
    return %arg0, %c0_i32 : i32, i32
  }
  func.func @transform_1(%arg0: i32) -> (i32, i32) {
    %c0_i32 = arith.constant 0 : i32
    %c0_i32_0 = arith.constant 0 : i32
    %c0_i32_1 = arith.constant 0 : i32
    return %c0_i32, %c0_i32_0 : i32, i32
  }
  func.func @transform_2(%arg0: i32) -> (i32, i32) {
    %c0_i32 = arith.constant 0 : i32
    %c0_i32_0 = arith.constant 0 : i32
    return %arg0, %c0_i32 : i32, i32
  }
}

</mosaic_0001>

<bundles_post_ra>
// kernel: tpu_custom_call.1
= control target key start
LH: loop header
LB: loop body
LE: loop exit
PB: predicated region body
PF: predicated region fallthrough
CT: control target
= control target key end

     0   :  { %7 = vsyncpa [#allocation3], 0  ;;  %s1100_s0 = inlined_call_operand.hbm [shape: f32[256,256], index: 0, kind: input, shape index: {}]   ;;  %s1101_s1 = inlined_call_operand.hbm [shape: bf16[256,128], index: 1, kind: input, shape index: {}]   ;;  %s1102_s2 = inlined_call_operand.hbm [shape: f32[256,128], index: 2, kind: output, shape index: {}]  }
   0x1   :  { %9 = vsyncpa [#allocation3 + $0x1], 0 }
   0x2   :  { %10 = vsyncpa [#allocation6], 0 }
   0x3   :  { %11 = vsyncpa [#allocation4], 0 }
   0x4   :  { %13 = vsyncpa [#allocation4 + $0x1], 0  ;;  %s906_s9 = smov 0   ;;  %s908_s10 = smov 0  }
   0x5   :  { %s910_s11 = smov 0   ;;  %s912_s12 = smov 0  }
   0x6 LB: > { %s927_s13 = sadd.s32 4294967295, %s882_s12   ;;  %s573_s14 = sadd.s32 4294967294, %s882_s12   ;;  %s882_s12 = sphi %s912_s12, %s1112_s12   ;;  %s878_s11 = sphi %s910_s11, %s1111_s11   ;;  %s874_s10 = sphi %s908_s10, %s1110_s10   ;;  %s870_s9 = sphi %s906_s9, %s1109_s9  }
   0x7   : > { %p39_p0 = scmp.ne.s32.totalorder %s874_s10, %s870_s9  ;;  %p40_p1 = scmp.eq.s32.totalorder %s927_s13, 0 }
   0x8   : > { %p84_p2 = scmp.eq.s32.totalorder %s927_s13, 1  ;;  %p90_p3 = scmp.eq.s32.totalorder %s573_s14, 1 }
   0x9   : > { %p936_p4 = por %p40_p1, %p39_p0  ;;  %p574_p5 = scmp.ge.s32.totalorder %s882_s12, 1 }
   0xa   : > { %p941_p6 = por %p90_p3, %p39_p0  ;;  %p97_p7 = scmp.lt.s32.totalorder %s882_s12, 3 }
   0xb   : > { %s108_s19 = sshll.u32 %s1101_s1, 4  ;;  %s884_s21 = smov [#allocation5]   ;;  %s109_s19 = int_to_ptr.hbm [resolvable:$true] %s108_s19 }
   0xc   : > { %p949_p8 = pnand %p574_p5, %p97_p7  ;;  %s110_s22 = sshll.u32 %s884_s21, 4  ;;  %s111_s22 = int_to_ptr.vmem [resolvable:$true] %s110_s22 }
   0xd   : > { %s959_s23 = sadd.s32 1, %s882_s12   ;;  %s885_s24 = smov 64  }
   0xe   : > { %p697_p9 = pneg %p949_p8  ;;  %s886_s25 = smov 4  }
   0xf   : > { %s23_s26 = ssub.s32 %s882_s12, %s959_s23  ;;  %s26_s27 = sadd.s32 1, %s878_s11 }
  0x10   : > { %p698_p10 = pnand %p697_p9, %p40_p1  ;;  %p24_p12 = scmp.eq.s32.totalorder %s23_s26, 0 }
  0x11   : > { %p33_p13 = scmp.ne.s32.totalorder %s878_s11, %s874_s10  ;;  %p34_p0 = scmp.eq.s32.totalorder %s882_s12, 0 }
  0x12   : > { %700 = dma.hbm_to_vmem [thread:$0]  (!%p698_p10), %s109_s19, 2048, %s111_s22, [#allocation6], %s885_s24, %s885_s24, %s886_s25  }
  0x13   : > { %p710_p3 = scmp.lt.s32.totalorder %s882_s12, 2  ;;  %p35_p5 = por %p34_p0, %p33_p13 }
  0x14   : > { %s969_s28 = scalar_select %p24_p12, %s878_s11, %s26_s27  }
  0x15   : > { %p973_p7 = por %p84_p2, %p33_p13  ;;  %s124_s30 = sand.u32 1, %s878_s11  }
  0x16   : > { %s655_s3 = sshll.u32 %s882_s12, 8  ;;  %s577_s4 = sshll.u32 %s124_s30, 8 }
  0x17   : > { %s134_s7 = scalar_lea.hbm %s1100_s0, %s655_s3  ;;  %s128_s14 = scalar_lea.vmem [#allocation2], %s577_s4 }
  0x18   : > { %s135_s8 = sshll.u32 %s134_s7, 4  ;;  %s137_s17 = sshll.u32 %s128_s14, 4  ;;  %s136_s8 = int_to_ptr.hbm [resolvable:$true] %s135_s8  ;;  %s138_s17 = int_to_ptr.vmem [resolvable:$true] %s137_s17 }
  0x19   : > { %p984_p9 = pnand %p710_p3, %p35_p5  ;;  %s125_s19 = scalar_lea.sflag [#allocation3], %s124_s30 }
  0x1a   : > { %s782_s21 = sshra.s32 %s136_s8, 4  ;;  %s789_s26 = scalar_lea.hbm %s1100_s0, 512  ;;  %s783_s21 = int_to_ptr.hbm [resolvable:$true] %s782_s21 }
  0x1b   : > { %s784_s22 = scalar_lea.hbm %s783_s21, 256  ;;  %p786_p10 = pneg %p984_p9 }
  0x1c   : > { %p785_p2 = scmp.ne.s32.totalorder %s783_s21, %s784_s22  ;;  %p790_p0 = scmp.lt.s32.totalorder %s783_s21, %s1100_s0 }
  0x1d   : > { %p791_p3 = scmp.lt.s32.totalorder %s789_s26, %s784_s22 }
  0x1e   : > { %p787_p12 = pnand %p786_p10, %p785_p2 }
  0x1f   : > { %p792_p5 = por %p791_p3, %p790_p0 }
  0x20   : > { %p788_p13 = pneg %p787_p12 }
  0x22   : > { %p793_p11 = pnand %p792_p5, %p788_p13 }
  0x24   : > { %796 = shalt.err (!%p793_p11)
}
  0x25   : > { %s887_s30 = smov 256   ;;  %s888_s4 = smov 16  }
  0x26   : > { %704 = dma.hbm_to_vmem [thread:$0]  (!%p984_p9), %s136_s8, 4096, %s138_s17, %s125_s19, %s887_s30, %s887_s30, %s888_s4  }
  0x27   : > { %149 = sbr.rel (%p949_p8) target bundleno = 274 (0x112), region = 28  ;;  %s1001_s5 = sand.u32 (!%p949_p8), 1, %s874_s10  }
  0x28   : > { %s582_s6 = sshll.u32 (!%p949_p8), %s1001_s5, 8  ;;  %s152_s7 = scalar_lea.sflag (!%p949_p8), [#allocation3], %s1001_s5 }
  0x29   : > { %s1005_s14 = scalar_lea.vmem (!%p949_p8), [#allocation2], %s582_s6 }
  0x2c   : > { %857 = dma.done.wait (%p936_p4), %s152_s7, 4096  }
  0x2d   : > { %859 = vsyncadd (%p936_p4), %s152_s7, 4294963200 }
  0x2e   : > { %861 = dma.done.wait (%p40_p1), [#allocation6], 2048  }
  0x2f   : > { %863 = vsyncadd (%p40_p1), [#allocation6], 4294965248  ;;  %v663_v0 = vld [vmem:[#allocation5 + $0x38] sm:$0xff]  ;;  %v662_v2 = vld [vmem:[#allocation5 + $0x30] sm:$0xff]  ;;  %s584_s15 = sshll.u32 %s1001_s5, 7  ;;  %s672_s8 = sshll.u32 %s927_s13, 7 }
  0x30   : > { %v671_v1 = vld [vmem:[#allocation5 + $0x78] sm:$0xff]  ;;  %360 = vmatpush.bf16.msra.mxu0 %v663_v0  ;;  %673 = vmatpush.bf16.msra.mxu2 %v663_v0  ;;  %v670_v3 = vld [vmem:[#allocation5 + $0x70] sm:$0xff]  ;;  %v661_v4 = vld [vmem:[#allocation5 + $0x28] sm:$0xff]  ;;  %s1048_s20 = scalar_lea.vmem [#allocation7], %s584_s15  ;;  %s486_s19 = scalar_lea.hbm %s1102_s2, %s672_s8 }
  0x31   : > { %409 = vmatpush.bf16.msra.mxu1 %v671_v1  ;;  %681 = vmatpush.bf16.msra.mxu3 %v671_v1  ;;  %v669_v5 = vld [vmem:[#allocation5 + $0x68] sm:$0xff]  ;;  %v660_v6 = vld [vmem:[#allocation5 + $0x20] sm:$0xff]  ;;  %v659_v8 = vld [vmem:[#allocation5 + $0x18] sm:$0xff]  ;;  %s487_s21 = sshll.u32 %s1048_s20, 4  ;;  %s489_s22 = sshll.u32 %s486_s19, 4  ;;  %s488_s21 = int_to_ptr.vmem [resolvable:$true] %s487_s21  ;;  %s490_s22 = int_to_ptr.hbm [resolvable:$true] %s489_s22 }
  0x32   : > { %v668_v7 = vld [vmem:[#allocation5 + $0x60] sm:$0xff]  ;;  %v667_v9 = vld [vmem:[#allocation5 + $0x58] sm:$0xff]  ;;  %v658_v10 = vld [vmem:[#allocation5 + $0x10] sm:$0xff]  ;;  %s475_s13 = scalar_lea.sflag [#allocation4], %s1001_s5  ;;  %s826_s24 = sshra.s32 %s490_s22, 4  ;;  %s827_s24 = int_to_ptr.hbm [resolvable:$true] %s826_s24 }
  0x33   : > { %v666_v11 = vld [vmem:[#allocation5 + $0x50] sm:$0xff]  ;;  %v657_v12 = vld [vmem:[#allocation5 + $0x8] sm:$0xff]  ;;  %v656_v14 = vld [vmem:[#allocation5] sm:$0xff]  ;;  %s828_s25 = scalar_lea.hbm %s827_s24, 128  ;;  %s832_s3 = scalar_lea.hbm %s1102_s2, 256 }
  0x34   : > { %361 = vmatpush.bf16.msra.mxu0 %v662_v2  ;;  %674 = vmatpush.bf16.msra.mxu2 %v662_v2  ;;  %v665_v13 = vld [vmem:[#allocation5 + $0x48] sm:$0xff]  ;;  %v664_v15 = vld [vmem:[#allocation5 + $0x40] sm:$0xff]  ;;  %v186_v17 = vld [vmem:[%s1005_s14 + $0x10] sm:$0xff]  ;;  %p829_p1 = scmp.ne.s32.totalorder %s827_s24, %s828_s25  ;;  %p833_p11 = scmp.lt.s32.totalorder %s827_s24, %s1102_s2 }
  0x35   : > { %410 = vmatpush.bf16.msra.mxu1 %v670_v3  ;;  %682 = vmatpush.bf16.msra.mxu3 %v670_v3  ;;  %v184_v16 = vld [vmem:[%s1005_s14] sm:$0xff]  ;;  %v202_v19 = vld [vmem:[%s1005_s14 + $0x90] sm:$0xff]  ;;  %v185_v20 = vld [vmem:[%s1005_s14 + $0x8] sm:$0xff]  ;;  %p834_p9 = scmp.lt.s32.totalorder %s832_s3, %s828_s25 }
  0x36   : > { %v200_v18 = vld [vmem:[%s1005_s14 + $0x80] sm:$0xff]  ;;  %v187_v21 = vld [vmem:[%s1005_s14 + $0x18] sm:$0xff]  ;;  %v201_v22 = vld [vmem:[%s1005_s14 + $0x88] sm:$0xff]  ;;  %v216_v24 = vpack.c.bf16 %v186_v17, %v184_v16  ;;  %p830_p4 = pnand %p829_p1, %p973_p7 }
  0x37   : > { %v203_v23 = vld [vmem:[%s1005_s14 + $0x98] sm:$0xff]  ;;  %v224_v25 = vpack.c.bf16 %v202_v19, %v200_v18  ;;  %v217_v26 = vpack.c.bf16 %v187_v21, %v185_v20  ;;  %v188_v28 = vld [vmem:[%s1005_s14 + $0x20] sm:$0xff]  ;;  %v190_v29 = vld [vmem:[%s1005_s14 + $0x30] sm:$0xff]  ;;  %p835_p2 = por %p834_p9, %p833_p11 }
  0x38   : > { %362 = vmatpush.bf16.msra.mxu0 %v661_v4  ;;  %675 = vmatpush.bf16.msra.mxu2 %v661_v4  ;;  %v225_v27 = vpack.c.bf16 %v203_v23, %v201_v22  ;;  %v204_v30 = vld [vmem:[%s1005_s14 + $0xa0] sm:$0xff]  ;;  %v206_v31 = vld [vmem:[%s1005_s14 + $0xb0] sm:$0xff]  ;;  %v189_v32 = vld [vmem:[%s1005_s14 + $0x28] sm:$0xff]  ;;  %v218_v36 = vpack.c.bf16 %v190_v29, %v188_v28  ;;  %p831_p8 = pneg %p830_p4 }
  0x39   : > { %411 = vmatpush.bf16.msra.mxu1 %v669_v5  ;;  %683 = vmatpush.bf16.msra.mxu3 %v669_v5  ;;  %v191_v33 = vld [vmem:[%s1005_s14 + $0x38] sm:$0xff]  ;;  %v205_v34 = vld [vmem:[%s1005_s14 + $0xa8] sm:$0xff]  ;;  %v226_v37 = vpack.c.bf16 %v206_v31, %v204_v30  ;;  %v192_v40 = vld [vmem:[%s1005_s14 + $0x40] sm:$0xff] }
  0x3a   : > { %v207_v35 = vld [vmem:[%s1005_s14 + $0xb8] sm:$0xff]  ;;  %v219_v38 = vpack.c.bf16 %v191_v33, %v189_v32  ;;  %v194_v41 = vld [vmem:[%s1005_s14 + $0x50] sm:$0xff]  ;;  %v208_v42 = vld [vmem:[%s1005_s14 + $0xc0] sm:$0xff]  ;;  %p836_p10 = pnand %p835_p2, %p831_p8 }
  0x3b   : > { %v227_v39 = vpack.c.bf16 %v207_v35, %v205_v34  ;;  %v210_v43 = vld [vmem:[%s1005_s14 + $0xd0] sm:$0xff]  ;;  %v193_v44 = vld [vmem:[%s1005_s14 + $0x48] sm:$0xff]  ;;  %v195_v45 = vld [vmem:[%s1005_s14 + $0x58] sm:$0xff]  ;;  %v220_v48 = vpack.c.bf16 %v194_v41, %v192_v40 }
  0x3c   : > { %363 = vmatpush.bf16.msra.mxu0 %v660_v6  ;;  %676 = vmatpush.bf16.msra.mxu2 %v660_v6  ;;  %v209_v46 = vld [vmem:[%s1005_s14 + $0xc8] sm:$0xff]  ;;  %v211_v47 = vld [vmem:[%s1005_s14 + $0xd8] sm:$0xff]  ;;  %v228_v49 = vpack.c.bf16 %v210_v43, %v208_v42  ;;  %v221_v50 = vpack.c.bf16 %v195_v45, %v193_v44  ;;  %v196_v52 = vld [vmem:[%s1005_s14 + $0x60] sm:$0xff] }
  0x3d   : > { %412 = vmatpush.bf16.msra.mxu1 %v668_v7  ;;  %684 = vmatpush.bf16.msra.mxu3 %v668_v7  ;;  %v229_v51 = vpack.c.bf16 %v211_v47, %v209_v46  ;;  %v198_v53 = vld [vmem:[%s1005_s14 + $0x70] sm:$0xff]  ;;  %v212_v54 = vld [vmem:[%s1005_s14 + $0xe0] sm:$0xff]  ;;  %v197_v56 = vld [vmem:[%s1005_s14 + $0x68] sm:$0xff] }
  0x3e   : > { %v214_v55 = vld [vmem:[%s1005_s14 + $0xf0] sm:$0xff]  ;;  %v199_v57 = vld [vmem:[%s1005_s14 + $0x78] sm:$0xff]  ;;  %v213_v58 = vld [vmem:[%s1005_s14 + $0xe8] sm:$0xff]  ;;  %v222_v60 = vpack.c.bf16 %v198_v53, %v196_v52 }
  0x3f   : > { %v215_v59 = vld [vmem:[%s1005_s14 + $0xf8] sm:$0xff]  ;;  %v230_v61 = vpack.c.bf16 %v214_v55, %v212_v54  ;;  %v223_v62 = vpack.c.bf16 %v199_v57, %v197_v56 }
  0x40   : > { %364 = vmatpush.bf16.msra.mxu0 %v659_v8  ;;  %677 = vmatpush.bf16.msra.mxu2 %v659_v8  ;;  %v231_v63 = vpack.c.bf16 %v215_v59, %v213_v58 }
  0x41   : > { %413 = vmatpush.bf16.msra.mxu1 %v667_v9  ;;  %685 = vmatpush.bf16.msra.mxu3 %v667_v9 }
  0x44   : > { %365 = vmatpush.bf16.msra.mxu0 %v658_v10  ;;  %678 = vmatpush.bf16.msra.mxu2 %v658_v10 }
  0x45   : > { %414 = vmatpush.bf16.msra.mxu1 %v666_v11  ;;  %686 = vmatpush.bf16.msra.mxu3 %v666_v11 }
  0x48   : > { %366 = vmatpush.bf16.msra.mxu0 %v657_v12  ;;  %679 = vmatpush.bf16.msra.mxu2 %v657_v12 }
  0x49   : > { %415 = vmatpush.bf16.msra.mxu1 %v665_v13  ;;  %687 = vmatpush.bf16.msra.mxu3 %v665_v13 }
  0x4c   : > { %367 = vmatpush.bf16.msra.mxu0 %v656_v14  ;;  %680 = vmatpush.bf16.msra.mxu2 %v656_v14 }
  0x4d   : > { %416 = vmatpush.bf16.msra.mxu1 %v664_v15  ;;  %688 = vmatpush.bf16.msra.mxu3 %v664_v15 }
  0x4f   : > { %368 = vmatmul.bf16.vlgmr.msra.gmra.mxu0 %v216_v24  ;;  %388 = vmatmul.bf16.vlgmr.msra.gmra.mxu2 %v224_v25 }
  0x50   : > { %417 = vmatmul.bf16.vlgmr.msra.gmra.mxu1 %v217_v26  ;;  %437 = vmatmul.bf16.vlgmr.msra.gmra.mxu3 %v225_v27 }
  0x5f   : > { %373 = vmatmul.bf16.gmra.mxu0 %v218_v36  ;;  %393 = vmatmul.bf16.gmra.mxu2 %v226_v37 }
  0x60   : > { %422 = vmatmul.bf16.gmra.mxu1 %v219_v38  ;;  %442 = vmatmul.bf16.gmra.mxu3 %v227_v39 }
  0x6f   : > { %378 = vmatmul.bf16.gmra.mxu0 %v220_v48  ;;  %398 = vmatmul.bf16.gmra.mxu2 %v228_v49 }
  0x70   : > { %427 = vmatmul.bf16.gmra.mxu1 %v221_v50  ;;  %447 = vmatmul.bf16.gmra.mxu3 %v229_v51 }
  0x7f   : > { %383 = vmatmul.bf16.gmra.mxu0 %v222_v60  ;;  %403 = vmatmul.bf16.gmra.mxu2 %v230_v61 }
  0x80   : > { %432 = vmatmul.bf16.gmra.mxu1 %v223_v62  ;;  %452 = vmatmul.bf16.gmra.mxu3 %v231_v63 }
  0xcc   : > { %v369_v0 = vpop.f32.mrf.mxu0 }
  0xcd   : > { %v418_v1 = vpop.f32.mrf.mxu1 }
  0xce   : > { %v419_v2 = vadd.f32 %v418_v1, %v369_v0 }
  0xd0   : > { %458 = vst [vmem:[%s1048_s20] sm:$0xff] %v419_v2 }
  0xd2   : > { %v389_v3 = vpop.f32.mrf.mxu2 }
  0xd3   : > { %v438_v4 = vpop.f32.mrf.mxu3 }
  0xd4   : > { %v439_v5 = vadd.f32 %v438_v4, %v389_v3  ;;  %v371_v6 = vpop.f32.mrf.mxu0 }
  0xd5   : > { %v420_v7 = vpop.f32.mrf.mxu1 }
  0xd6   : > { %466 = vst [vmem:[%s1048_s20 + $0x40] sm:$0xff] %v439_v5  ;;  %v421_v8 = vadd.f32 %v420_v7, %v371_v6 }
  0xd8   : > { %459 = vst [vmem:[%s1048_s20 + $0x8] sm:$0xff] %v421_v8 }
  0xda   : > { %v391_v9 = vpop.f32.mrf.mxu2 }
  0xdb   : > { %v440_v10 = vpop.f32.mrf.mxu3 }
  0xdc   : > { %v441_v11 = vadd.f32 %v440_v10, %v391_v9  ;;  %v374_v12 = vpop.f32.mrf.mxu0 }
  0xdd   : > { %v423_v13 = vpop.f32.mrf.mxu1 }
  0xde   : > { %467 = vst [vmem:[%s1048_s20 + $0x48] sm:$0xff] %v441_v11  ;;  %v424_v14 = vadd.f32 %v423_v13, %v374_v12 }
  0xe0   : > { %460 = vst [vmem:[%s1048_s20 + $0x10] sm:$0xff] %v424_v14 }
  0xe2   : > { %v394_v15 = vpop.f32.mrf.mxu2 }
  0xe3   : > { %v443_v16 = vpop.f32.mrf.mxu3 }
  0xe4   : > { %v444_v17 = vadd.f32 %v443_v16, %v394_v15  ;;  %v376_v18 = vpop.f32.mrf.mxu0 }
  0xe5   : > { %v425_v19 = vpop.f32.mrf.mxu1 }
  0xe6   : > { %468 = vst [vmem:[%s1048_s20 + $0x50] sm:$0xff] %v444_v17  ;;  %v426_v20 = vadd.f32 %v425_v19, %v376_v18 }
  0xe8   : > { %461 = vst [vmem:[%s1048_s20 + $0x18] sm:$0xff] %v426_v20 }
  0xea   : > { %v396_v21 = vpop.f32.mrf.mxu2 }
  0xeb   : > { %v445_v22 = vpop.f32.mrf.mxu3 }
  0xec   : > { %v446_v23 = vadd.f32 %v445_v22, %v396_v21  ;;  %v379_v24 = vpop.f32.mrf.mxu0 }
  0xed   : > { %v428_v25 = vpop.f32.mrf.mxu1 }
  0xee   : > { %469 = vst [vmem:[%s1048_s20 + $0x58] sm:$0xff] %v446_v23  ;;  %v429_v26 = vadd.f32 %v428_v25, %v379_v24 }
  0xf0   : > { %462 = vst [vmem:[%s1048_s20 + $0x20] sm:$0xff] %v429_v26 }
  0xf2   : > { %v399_v27 = vpop.f32.mrf.mxu2 }
  0xf3   : > { %v448_v28 = vpop.f32.mrf.mxu3 }
  0xf4   : > { %v449_v29 = vadd.f32 %v448_v28, %v399_v27  ;;  %v381_v30 = vpop.f32.mrf.mxu0 }
  0xf5   : > { %v430_v31 = vpop.f32.mrf.mxu1 }
  0xf6   : > { %470 = vst [vmem:[%s1048_s20 + $0x60] sm:$0xff] %v449_v29  ;;  %v431_v32 = vadd.f32 %v430_v31, %v381_v30 }
  0xf8   : > { %463 = vst [vmem:[%s1048_s20 + $0x28] sm:$0xff] %v431_v32 }
  0xfa   : > { %v401_v33 = vpop.f32.mrf.mxu2 }
  0xfb   : > { %v450_v34 = vpop.f32.mrf.mxu3 }
  0xfc   : > { %v451_v35 = vadd.f32 %v450_v34, %v401_v33  ;;  %v384_v36 = vpop.f32.mrf.mxu0 }
  0xfd   : > { %v433_v37 = vpop.f32.mrf.mxu1 }
  0xfe   : > { %471 = vst [vmem:[%s1048_s20 + $0x68] sm:$0xff] %v451_v35  ;;  %v434_v38 = vadd.f32 %v433_v37, %v384_v36 }
 0x100   : > { %464 = vst [vmem:[%s1048_s20 + $0x30] sm:$0xff] %v434_v38 }
 0x102   : > { %v404_v39 = vpop.f32.mrf.mxu2 }
 0x103   : > { %v453_v40 = vpop.f32.mrf.mxu3 }
 0x104   : > { %v454_v41 = vadd.f32 %v453_v40, %v404_v39  ;;  %v386_v42 = vpop.f32.mrf.mxu0 }
 0x105   : > { %v435_v43 = vpop.f32.mrf.mxu1 }
 0x106   : > { %472 = vst [vmem:[%s1048_s20 + $0x70] sm:$0xff] %v454_v41  ;;  %v436_v44 = vadd.f32 %v435_v43, %v386_v42 }
 0x108   : > { %465 = vst [vmem:[%s1048_s20 + $0x38] sm:$0xff] %v436_v44 }
 0x10a   : > { %v406_v45 = vpop.f32.mrf.mxu2 }
 0x10b   : > { %v455_v46 = vpop.f32.mrf.mxu3 }
 0x10c   : > { %v456_v47 = vadd.f32 %v455_v46, %v406_v45 }
 0x10e   : > { %473 = vst [vmem:[%s1048_s20 + $0x78] sm:$0xff] %v456_v47 }
 0x10f   : > { %839 = shalt.err (!%p836_p10)
}
 0x110   : > { %s889_s5 = smov 128   ;;  %s890_s6 = smov 8  }
 0x111   : > { %695 = dma.vmem_to_hbm [thread:$0]  (%p973_p7), %s488_s21, 2048, %s490_s22, %s475_s13, %s889_s5, %s889_s5, %s890_s6  }
 0x112 PF: > { %s504_s7 = sand.u32 1, %s870_s9   ;;  %p1108_p12 = scmp.ge.s32.totalorder %s882_s12, 2 }
 0x113   : > { %s505_s14 = scalar_lea.sflag [#allocation4], %s504_s7 }
 0x114   : > { %p706_p13 = pnand %p1108_p12, %p941_p6 }
 0x116   : > { %p707_p0 = pneg %p706_p13 }
 0x118   : > { %865 = dma.done.wait (%p707_p0), %s505_s14, 2048  }
 0x119   : > { %867 = vsyncadd (%p707_p0), %s505_s14, 4294965248  ;;  %p16_p3 = scmp.ge.s32.totalorder %s959_s23, 4   ;;  %s1109_s9 = smov %s874_s10 }
 0x11a   : > { %s1110_s10 = smov %s878_s11  ;;  %s1111_s11 = smov %s969_s28 }
 0x11b   : > { %s1112_s12 = smov %s959_s23  ;;  %18 = sbr.rel (!%p16_p3) target bundleno = 6 (0x6), region = 77 }
 0x120   :  { %511 = vsyncpa [#allocation3], 1 }
 0x121   :  { %513 = vsyncpa [#allocation3 + $0x1], 1 }
 0x122   :  { %514 = vsyncpa [#allocation6], 1 }
 0x123   :  { %515 = vsyncpa [#allocation4], 1 }
 0x124   :  { %517 = vsyncpa [#allocation4 + $0x1], 1 }

</bundles_post_ra>
